<compile_context>
chip_gen: v6e
topology: v6e:2x2x1
jax: 0.10.0
libtpu: 0.0.40
codegen_flags: <defaults>
</compile_context>

<pallas_src>
import jax
import jax.numpy as jnp
from jax.experimental import pallas as pl
from jax.experimental.pallas import tpu as pltpu

LANES = 128
SUBLANES = 8
MAX_ROW_TILE = 2048  # (2048, 128) f32 block = 1 MiB per input per buffer


def _make_mqe_kernel(rows, row_tile, needs_mask):
    groups = row_tile // SUBLANES

    def kernel(pred_ref, true_ref, part_ref):
        d = pred_ref[...].astype(jnp.float32) - true_ref[...].astype(jnp.float32)
        d2 = d * d
        q = d2 * d2
        if needs_mask:
            row_ids = (pl.program_id(0) * row_tile
                       + jax.lax.broadcasted_iota(jnp.int32, (row_tile, LANES), 0))
            q = jnp.where(row_ids < rows, q, 0.0)
        # Reduce the (row_tile, 128) tile to one (8, 128) vreg of partial sums:
        # elementwise adds across vreg-aligned row groups (pure VPU work).
        part_ref[...] = jnp.sum(q.reshape(groups, SUBLANES, LANES), axis=0)

    return kernel


def mean_quartic_error(y_pred, y_true):
    assert y_pred.shape == y_true.shape, (y_pred.shape, y_true.shape)
    n_elems = int(y_pred.size)

    flat_pred = y_pred.reshape(-1)
    flat_true = y_true.reshape(-1)

    chunk = SUBLANES * LANES  # 1024
    padded = ((n_elems + chunk - 1) // chunk) * chunk
    if padded != n_elems:
        # Only awkward (non 1024-multiple) sizes pay this copy; zeros add 0 to
        # the sum and the mean still divides by the true n_elems.
        flat_pred = jnp.pad(flat_pred, (0, padded - n_elems))
        flat_true = jnp.pad(flat_true, (0, padded - n_elems))

    rows = padded // LANES               # multiple of 8
    row_tile = min(MAX_ROW_TILE, rows)   # multiple of 8
    num_blocks = (rows + row_tile - 1) // row_tile
    needs_mask = (rows % row_tile) != 0  # ragged last block -> mask in-kernel

    kernel = _make_mqe_kernel(rows, row_tile, needs_mask)

    partials = pl.pallas_call(
        kernel,
        out_shape=jax.ShapeDtypeStruct((num_blocks * SUBLANES, LANES), jnp.float32),
        grid=(num_blocks,),
        in_specs=[
            pl.BlockSpec((row_tile, LANES), lambda i: (i, 0)),
            pl.BlockSpec((row_tile, LANES), lambda i: (i, 0)),
        ],
        out_specs=pl.BlockSpec((SUBLANES, LANES), lambda i: (i, 0)),
        compiler_params=pltpu.CompilerParams(
            dimension_semantics=("parallel",),
        ),
    )(flat_pred.reshape(rows, LANES), flat_true.reshape(rows, LANES))

    # Final cross-block / cross-lane reduce + compile-time 1/N multiply.
    return jnp.sum(partials) * jnp.float32(1.0 / n_elems)


class MeanQuarticError:
    """Mirrors the PyTorch module; constructor args are unused in forward."""

    def __init__(self, b_lower, b_upper, tail_weight=4, middle_weight=3):
        self.b_lower = b_lower
        self.b_upper = b_upper

    def __call__(self, y_pred, y_true):
        return mean_quartic_error(y_pred, y_true)


if __name__ == "__main__":
    key = jax.random.PRNGKey(0)
    k1, k2 = jax.random.split(key)

    # Primary check: NCHW-style shapes typical of a conv-output loss.
    y_pred = jax.random.normal(k1, (2, 4, 16, 16), dtype=jnp.float32)
    y_true = jax.random.normal(k2, (2, 4, 16, 16), dtype=jnp.float32)

    loss_fn = MeanQuarticError(b_lower=0.0, b_upper=1.0)
    loss = jax.block_until_ready(loss_fn(y_pred, y_true))
    ref = jnp.mean((y_pred - y_true) ** 4)
    assert jnp.allclose(loss, ref, rtol=1e-5, atol=1e-6), (loss, ref)

    # Secondary check: multi-block grid with a ragged (masked) last tile.
    k3, k4 = jax.random.split(k2)
    y_pred2 = jax.random.normal(k3, (4, 8, 96, 96), dtype=jnp.float32)
    y_true2 = jax.random.normal(k4, (4, 8, 96, 96), dtype=jnp.float32)
    loss2 = jax.block_until_ready(mean_quartic_error(y_pred2, y_true2))
    ref2 = jnp.mean((y_pred2 - y_true2) ** 4)
    assert jnp.allclose(loss2, ref2, rtol=1e-4, atol=1e-6), (loss2, ref2)

    print("KERNEL_OK")
</pallas_src>

<mosaic_0001>
module attributes {stable_mosaic.version = 11 : i64} {
  func.func @kernel(%arg0: i32, %arg1: memref<16x128xf32, #tpu.memory_space<vmem>>, %arg2: memref<16x128xf32, #tpu.memory_space<vmem>>, %arg3: memref<8x128xf32, #tpu.memory_space<vmem>>) attributes {dimension_semantics = [#tpu.dimension_semantics<parallel>], iteration_bounds = array<i64: 1>, scalar_prefetch = 0 : i64, scratch_operands = 0 : i64, tpu.core_type = #tpu.core_type<tc>, window_params = [{transform_indices = @transform_0, window_bounds = array<i64: 16, 128>}, {transform_indices = @transform_1, window_bounds = array<i64: 16, 128>}, {transform_indices = @transform_2, window_bounds = array<i64: 8, 128>}]} {
    %c0 = arith.constant 0 : index
    %c0_0 = arith.constant 0 : index
    %0 = vector.load %arg1[%c0, %c0_0] : memref<16x128xf32, #tpu.memory_space<vmem>>, vector<16x128xf32>
    %c0_1 = arith.constant 0 : index
    %c0_2 = arith.constant 0 : index
    %1 = vector.load %arg2[%c0_1, %c0_2] : memref<16x128xf32, #tpu.memory_space<vmem>>, vector<16x128xf32>
    %2 = arith.subf %0, %1 : vector<16x128xf32>
    %3 = arith.mulf %2, %2 : vector<16x128xf32>
    %4 = arith.mulf %3, %3 : vector<16x128xf32>
    %5 = vector.shape_cast %4 : vector<16x128xf32> to vector<2x8x128xf32>
    %cst = arith.constant dense<0.000000e+00> : vector<8x128xf32>
    %6 = vector.multi_reduction <add>, %5, %cst [0] : vector<2x8x128xf32> to vector<8x128xf32>
    %c0_3 = arith.constant 0 : index
    %c0_4 = arith.constant 0 : index
    %7 = vector.load %arg3[%c0_3, %c0_4] : memref<8x128xf32, #tpu.memory_space<vmem>>, vector<8x128xf32>
    tpu.vector_store %arg3[%c0_3, %c0_4], %6 {strides = array<i32>} : memref<8x128xf32, #tpu.memory_space<vmem>>, vector<8x128xf32>,
    return
  }
  func.func @transform_0(%arg0: i32) -> (i32, i32) {
    %c0_i32 = arith.constant 0 : i32
    %c0_i32_0 = arith.constant 0 : i32
    return %arg0, %c0_i32 : i32, i32
  }
  func.func @transform_1(%arg0: i32) -> (i32, i32) {
    %c0_i32 = arith.constant 0 : i32
    %c0_i32_0 = arith.constant 0 : i32
    return %arg0, %c0_i32 : i32, i32
  }
  func.func @transform_2(%arg0: i32) -> (i32, i32) {
    %c0_i32 = arith.constant 0 : i32
    %c0_i32_0 = arith.constant 0 : i32
    return %arg0, %c0_i32 : i32, i32
  }
}

</mosaic_0001>

<bundles_post_ra>
// kernel: tpu_custom_call.1
= control target key start
LH: loop header
LB: loop body
LE: loop exit
PB: predicated region body
PF: predicated region fallthrough
CT: control target
= control target key end

     0   :  { %7 = vsyncpa [#allocation3], 0  ;;  %s168_s0 = inlined_call_operand.hbm [shape: f32[16,128], index: 0, kind: input, shape index: {}]   ;;  %s169_s1 = inlined_call_operand.hbm [shape: f32[16,128], index: 1, kind: input, shape index: {}]   ;;  %s170_s2 = inlined_call_operand.hbm [shape: f32[8,128], index: 2, kind: output, shape index: {}]  }
   0x1   :  { %8 = vsyncpa [#allocation6], 0 }
   0x2   :  { %9 = vsyncpa [#allocation4], 0  ;;  %s139_s9 = smov [#allocation2]  }
   0x3   :  { %s15_s10 = sshll.u32 %s139_s9, 4  ;;  %s16_s10 = int_to_ptr.vmem [resolvable:$true] %s15_s10 }
   0x4   :  { %s81_s11 = scalar_lea.vmem %s16_s10, 256  ;;  %p86_p1 = scmp.lt.s32.totalorder %s16_s10, %s16_s10 }
   0x5   :  { %p82_p0 = scmp.ne.s32.totalorder %s16_s10, %s81_s11  ;;  %p87_p2 = scmp.lt.s32.totalorder %s81_s11, %s81_s11 }
   0x7   :  { %p88_p3 = por %p87_p2, %p86_p1 }
   0x9   :  { %p89_p4 = pnand %p88_p3, %p82_p0 }
   0xb   :  { %92 = shalt.err (!%p89_p4)
}
   0xc   :  { %s140_s12 = smov 128   ;;  %s141_s13 = smov 8  }
   0xd   :  { %21 = dma.hbm_to_vmem [thread:$0]  %s168_s0, 256, %s16_s10, [#allocation3], %s140_s12, %s140_s12, %s141_s13  }
   0xe   :  { %s142_s16 = smov [#allocation5]  }
   0xf   :  { %s27_s17 = sshll.u32 %s142_s16, 4  ;;  %s28_s17 = int_to_ptr.vmem [resolvable:$true] %s27_s17 }
  0x10   :  { %s101_s18 = scalar_lea.vmem %s28_s17, 256  ;;  %p106_p6 = scmp.lt.s32.totalorder %s28_s17, %s28_s17 }
  0x11   :  { %p102_p5 = scmp.ne.s32.totalorder %s28_s17, %s101_s18  ;;  %p107_p7 = scmp.lt.s32.totalorder %s101_s18, %s101_s18 }
  0x13   :  { %p108_p8 = por %p107_p7, %p106_p6 }
  0x15   :  { %p109_p9 = pnand %p108_p8, %p102_p5 }
  0x17   :  { %112 = shalt.err (!%p109_p9)
}
  0x18   :  { %33 = dma.hbm_to_vmem [thread:$0]  %s169_s1, 256, %s28_s17, [#allocation6], %s140_s12, %s140_s12, %s141_s13  }
  0x19   :  { %133 = dma.done.wait [#allocation3], 256  }
  0x1a   :  { %134 = vsyncadd [#allocation3], 4294967040 }
  0x1b   :  { %135 = dma.done.wait [#allocation6], 256  }
  0x1c   :  { %136 = vsyncadd [#allocation6], 4294967040  ;;  %v40_v0 = vld [vmem:[#allocation2] sm:$0xff]  ;;  %v41_v1 = vld [vmem:[#allocation2 + $0x8] sm:$0xff]  ;;  %s143_s0 = smov [#allocation7]  }
  0x1d   :  { %v42_v2 = vld [vmem:[#allocation5] sm:$0xff]  ;;  %v43_v3 = vld [vmem:[#allocation5 + $0x8] sm:$0xff]  ;;  %s58_s21 = sshll.u32 %s143_s0, 4  ;;  %s59_s21 = int_to_ptr.vmem [resolvable:$true] %s58_s21 }
  0x1e   :  { %v44_v4 = vsub.f32 %v40_v0, %v42_v2  ;;  %v45_v5 = vsub.f32 %v41_v1, %v43_v3  ;;  %s113_s1 = scalar_lea.vmem %s59_s21, 128  ;;  %p118_p11 = scmp.lt.s32.totalorder %s59_s21, %s59_s21 }
  0x1f   :  { %p114_p10 = scmp.ne.s32.totalorder %s59_s21, %s113_s1  ;;  %p119_p12 = scmp.lt.s32.totalorder %s113_s1, %s113_s1 }
  0x20   :  { %v46_v6 = vmul.f32 %v44_v4, %v44_v4  ;;  %v47_v7 = vmul.f32 %v45_v5, %v45_v5 }
  0x21   :  { %p120_p13 = por %p119_p12, %p118_p11 }
  0x22   :  { %v48_v8 = vmul.f32 %v46_v6, %v46_v6  ;;  %v49_v9 = vmul.f32 %v47_v7, %v47_v7 }
  0x23   :  { %p121_p0 = pnand %p120_p13, %p114_p10 }
  0x24   :  { %v50_v10 = vadd.f32 %v49_v9, %v48_v8 }
  0x26   :  { %51 = vst [vmem:[#allocation7] sm:$0xff] %v50_v10 }
  0x27   :  { %124 = shalt.err (!%p121_p0)
}
  0x28   :  { %61 = dma.vmem_to_hbm [thread:$0]  %s59_s21, 128, %s170_s2, [#allocation4]  }
  0x29   :  { %137 = dma.done.wait [#allocation4], 128  }
  0x2a   :  { %138 = vsyncadd [#allocation4], 4294967168 }
  0x2b   :  { %65 = vsyncpa [#allocation3], 1 }
  0x2c   :  { %66 = vsyncpa [#allocation6], 1 }
  0x2d   :  { %67 = vsyncpa [#allocation4], 1 }

</bundles_post_ra>
